<compile_context>
chip_gen: v7x
topology: tpu7x:2x2x1
jax: 0.10.0
libtpu: 0.0.40
codegen_flags: <defaults>
</compile_context>

<pallas_src>
import jax
import jax.numpy as jnp
from jax.experimental import pallas as pl
from jax.experimental.pallas import tpu as pltpu

_SUBLANE = 8     # f32 sublane packing (second-to-last dim)


def _round_up(n, m):
    return ((n + m - 1) // m) * m


def _mlp_kernel(x_ref, w1_ref, b1_ref, w2_ref, b2_ref, w3_ref, b3_ref, o_ref):
    # One batch tile: fused fc1/fc2/fc3 (MXU) + bias/ReLU (VPU), all in f32.
    x = x_ref[...]

    h = jnp.dot(x, w1_ref[...], preferred_element_type=jnp.float32) + b1_ref[...]
    h = jnp.maximum(h, 0.0)

    h = jnp.dot(h, w2_ref[...], preferred_element_type=jnp.float32) + b2_ref[...]
    h = jnp.maximum(h, 0.0)

    h = jnp.dot(h, w3_ref[...], preferred_element_type=jnp.float32) + b3_ref[...]
    h = jnp.maximum(h, 0.0)

    o_ref[...] = h.astype(o_ref.dtype)


def mlp_forward(x, params, *, block_batch=2048):
    """Fused forward pass of the 3-layer ReLU MLP as a single batch-gridded Pallas call."""
    w1, b1, w2, b2, w3, b3 = params
    B, F = x.shape
    d_h1 = w1.shape[1]
    d_h2 = w2.shape[1]
    d_out = w3.shape[1]

    # Narrow lane padding on the output: pad the last layer only to the f32
    # sublane multiple (8 cols).  The output HBM array itself is (B, 8), so the
    # writeback DMA stays contiguous and tiny; the wrapper slices [:, :d_out].
    n_pad = max(_SUBLANE, _round_up(d_out, _SUBLANE))
    w3p = jnp.zeros((w3.shape[0], n_pad), w3.dtype).at[:, :d_out].set(w3)
    b3p = jnp.zeros((1, n_pad), b3.dtype).at[:, :d_out].set(b3)

    # Batch tile: aim for >= 2 grid steps whenever the batch is non-tiny so the
    # "parallel" batch axis can shard across both TensorCores on v7x; cap at
    # `block_batch`; round to the f32 sublane multiple; pad the batch to cover.
    if B > 2 * _SUBLANE:
        tb_target = _round_up(pl.cdiv(B, 2), _SUBLANE)
    else:
        tb_target = _round_up(B, _SUBLANE)
    tb = max(_SUBLANE, min(block_batch, tb_target))
    b_padded = _round_up(B, tb)
    if b_padded != B:
        x = jnp.pad(x, ((0, b_padded - B), (0, 0)))
    grid = (b_padded // tb,)

    # Weights/biases: full blocks with constant index_maps -> DMA'd once,
    # VMEM-resident for every grid step.
    def const_spec(arr):
        return pl.BlockSpec(arr.shape, lambda i, _nd=arr.ndim: (0,) * _nd)

    flops = 2 * b_padded * (F * d_h1 + d_h1 * d_h2 + d_h2 * d_out)
    bytes_accessed = 4 * (
        b_padded * F + b_padded * n_pad
        + w1.size + b1.size + w2.size + b2.size + w3p.size + b3p.size
    )

    out = pl.pallas_call(
        _mlp_kernel,
        out_shape=jax.ShapeDtypeStruct((b_padded, n_pad), jnp.float32),
        grid=grid,
        in_specs=[
            pl.BlockSpec((tb, F), lambda i: (i, 0)),   # x: batch-tiled, pipelined
            const_spec(w1), const_spec(b1),
            const_spec(w2), const_spec(b2),
            const_spec(w3p), const_spec(b3p),
        ],
        out_specs=pl.BlockSpec((tb, n_pad), lambda i: (i, 0)),
        compiler_params=pltpu.CompilerParams(
            dimension_semantics=("parallel",),   # shard batch tiles across TCs on v7x
            vmem_limit_bytes=32 << 20,
        ),
        cost_estimate=pl.CostEstimate(
            flops=flops, transcendentals=0, bytes_accessed=bytes_accessed),
    )(x, w1, b1, w2, b2, w3p, b3p)

    # Strip batch padding and the lane padding on the logits.
    return out[:B, :d_out]


def init_params(key, z_dim):
    """Deterministic init mimicking torch.nn.Linear default (uniform +/- 1/sqrt(fan_in)).
    Weights are returned already transposed to (in_features, out_features)."""
    d_in = z_dim * 3
    d_h1 = z_dim * 3
    d_h2 = int(z_dim * 3 / 2)
    d_out = 3

    dims = [(d_in, d_h1), (d_h1, d_h2), (d_h2, d_out)]
    params = []
    for (fan_in, fan_out) in dims:
        key, kw, kb = jax.random.split(key, 3)
        bound = 1.0 / jnp.sqrt(jnp.float32(fan_in))
        w = jax.random.uniform(kw, (fan_in, fan_out), jnp.float32, -bound, bound)
        b = jax.random.uniform(kb, (1, fan_out), jnp.float32, -bound, bound)
        params += [w, b]
    return tuple(params)


def reference_forward(x, params):
    w1, b1, w2, b2, w3, b3 = params
    h = jnp.maximum(x @ w1 + b1, 0.0)
    h = jnp.maximum(h @ w2 + b2, 0.0)
    return jnp.maximum(h @ w3 + b3, 0.0)


if __name__ == "__main__":
    z_dim = 32          # -> fc1: 96->96, fc2: 96->48, fc3: 48->3
    key = jax.random.PRNGKey(0)
    key, kx1, kx2 = jax.random.split(key, 3)
    params = init_params(key, z_dim)

    # (1) Small batch: single tile, single grid step (tiny-batch fallback path).
    x_small = jax.random.normal(kx1, (8, z_dim * 3), jnp.float32)
    out_s = jax.block_until_ready(mlp_forward(x_small, params))
    ref_s = reference_forward(x_small, params)
    assert out_s.shape == (8, 3), out_s.shape
    assert jnp.allclose(out_s, ref_s, atol=1e-5, rtol=1e-5), "mismatch (small batch)"

    # (2) Multi-step batch grid with batch padding (70 -> 96 rows, 3 grid steps):
    #     exercises pipelining, the parallel batch axis, and the pad/slice path.
    x_big = jax.random.normal(kx2, (70, z_dim * 3), jnp.float32)
    out_b = jax.block_until_ready(mlp_forward(x_big, params, block_batch=32))
    ref_b = reference_forward(x_big, params)
    assert out_b.shape == (70, 3), out_b.shape
    assert jnp.allclose(out_b, ref_b, atol=1e-5, rtol=1e-5), "mismatch (gridded batch)"

    # (3) Default-tile path: >2*SUBLANE batch, default block_batch -> 2 parallel steps.
    x_mid = jax.random.normal(key, (40, z_dim * 3), jnp.float32)
    out_m = jax.block_until_ready(mlp_forward(x_mid, params))
    ref_m = reference_forward(x_mid, params)
    assert out_m.shape == (40, 3), out_m.shape
    assert jnp.allclose(out_m, ref_m, atol=1e-5, rtol=1e-5), "mismatch (default tile)"

    print("KERNEL_OK")
</pallas_src>

<mosaic_0001>
module attributes {stable_mosaic.version = 11 : i64} {
  func.func @_mlp_kernel(%arg0: i32, %arg1: memref<8x96xf32, #tpu.memory_space<vmem>>, %arg2: memref<96x96xf32, #tpu.memory_space<vmem>>, %arg3: memref<1x96xf32, #tpu.memory_space<vmem>>, %arg4: memref<96x48xf32, #tpu.memory_space<vmem>>, %arg5: memref<1x48xf32, #tpu.memory_space<vmem>>, %arg6: memref<48x8xf32, #tpu.memory_space<vmem>>, %arg7: memref<1x8xf32, #tpu.memory_space<vmem>>, %arg8: memref<8x8xf32, #tpu.memory_space<vmem>>) attributes {dimension_semantics = [#tpu.dimension_semantics<parallel>], iteration_bounds = array<i64: 1>, scalar_prefetch = 0 : i64, scratch_operands = 0 : i64, tpu.core_type = #tpu.core_type<tc>, window_params = [{transform_indices = @transform_0, window_bounds = array<i64: 8, 96>}, {pipeline_mode = #tpu.pipeline_mode<synchronous>, transform_indices = @transform_1, window_bounds = array<i64: 96, 96>}, {pipeline_mode = #tpu.pipeline_mode<synchronous>, transform_indices = @transform_2, window_bounds = array<i64: 1, 96>}, {pipeline_mode = #tpu.pipeline_mode<synchronous>, transform_indices = @transform_3, window_bounds = array<i64: 96, 48>}, {pipeline_mode = #tpu.pipeline_mode<synchronous>, transform_indices = @transform_4, window_bounds = array<i64: 1, 48>}, {pipeline_mode = #tpu.pipeline_mode<synchronous>, transform_indices = @transform_5, window_bounds = array<i64: 48, 8>}, {pipeline_mode = #tpu.pipeline_mode<synchronous>, transform_indices = @transform_6, window_bounds = array<i64: 1, 8>}, {transform_indices = @transform_7, window_bounds = array<i64: 8, 8>}]} {
    %c0 = arith.constant 0 : index
    %c0_0 = arith.constant 0 : index
    %0 = vector.load %arg1[%c0, %c0_0] : memref<8x96xf32, #tpu.memory_space<vmem>>, vector<8x96xf32>
    %c0_1 = arith.constant 0 : index
    %c0_2 = arith.constant 0 : index
    %1 = vector.load %arg2[%c0_1, %c0_2] : memref<96x96xf32, #tpu.memory_space<vmem>>, vector<96x96xf32>
    %cst = arith.constant dense<0.000000e+00> : vector<8x96xf32>
    %2 = tpu.matmul %0, %1, %cst {dimension_numbers = #tpu.dot_dimension_numbers<[1], [0], [0], [1], [0, 0, 1, 1], [], []>} : vector<8x96xf32>, vector<96x96xf32>, vector<8x96xf32> -> vector<8x96xf32>
    %c0_3 = arith.constant 0 : index
    %c0_4 = arith.constant 0 : index
    %3 = vector.load %arg3[%c0_3, %c0_4] : memref<1x96xf32, #tpu.memory_space<vmem>>, vector<1x96xf32>
    %4 = vector.broadcast %3 : vector<1x96xf32> to vector<8x96xf32>
    %5 = arith.addf %2, %4 : vector<8x96xf32>
    %cst_5 = arith.constant 0.000000e+00 : f32
    %6 = vector.broadcast %cst_5 : f32 to vector<8x96xf32>
    %7 = arith.maximumf %5, %6 : vector<8x96xf32>
    %c0_6 = arith.constant 0 : index
    %c0_7 = arith.constant 0 : index
    %8 = vector.load %arg4[%c0_6, %c0_7] : memref<96x48xf32, #tpu.memory_space<vmem>>, vector<96x48xf32>
    %cst_8 = arith.constant dense<0.000000e+00> : vector<8x48xf32>
    %9 = tpu.matmul %7, %8, %cst_8 {dimension_numbers = #tpu.dot_dimension_numbers<[1], [0], [0], [1], [0, 0, 1, 1], [], []>} : vector<8x96xf32>, vector<96x48xf32>, vector<8x48xf32> -> vector<8x48xf32>
    %c0_9 = arith.constant 0 : index
    %c0_10 = arith.constant 0 : index
    %10 = vector.load %arg5[%c0_9, %c0_10] : memref<1x48xf32, #tpu.memory_space<vmem>>, vector<1x48xf32>
    %11 = vector.broadcast %10 : vector<1x48xf32> to vector<8x48xf32>
    %12 = arith.addf %9, %11 : vector<8x48xf32>
    %cst_11 = arith.constant 0.000000e+00 : f32
    %13 = vector.broadcast %cst_11 : f32 to vector<8x48xf32>
    %14 = arith.maximumf %12, %13 : vector<8x48xf32>
    %c0_12 = arith.constant 0 : index
    %c0_13 = arith.constant 0 : index
    %15 = vector.load %arg6[%c0_12, %c0_13] : memref<48x8xf32, #tpu.memory_space<vmem>>, vector<48x8xf32>
    %cst_14 = arith.constant dense<0.000000e+00> : vector<8x8xf32>
    %16 = tpu.matmul %14, %15, %cst_14 {dimension_numbers = #tpu.dot_dimension_numbers<[1], [0], [0], [1], [0, 0, 1, 1], [], []>} : vector<8x48xf32>, vector<48x8xf32>, vector<8x8xf32> -> vector<8x8xf32>
    %c0_15 = arith.constant 0 : index
    %c0_16 = arith.constant 0 : index
    %17 = vector.load %arg7[%c0_15, %c0_16] : memref<1x8xf32, #tpu.memory_space<vmem>>, vector<1x8xf32>
    %18 = vector.broadcast %17 : vector<1x8xf32> to vector<8x8xf32>
    %19 = arith.addf %16, %18 : vector<8x8xf32>
    %cst_17 = arith.constant 0.000000e+00 : f32
    %20 = vector.broadcast %cst_17 : f32 to vector<8x8xf32>
    %21 = arith.maximumf %19, %20 : vector<8x8xf32>
    %c0_18 = arith.constant 0 : index
    %c0_19 = arith.constant 0 : index
    %22 = vector.load %arg8[%c0_18, %c0_19] : memref<8x8xf32, #tpu.memory_space<vmem>>, vector<8x8xf32>
    tpu.vector_store %arg8[%c0_18, %c0_19], %21 {strides = array<i32>} : memref<8x8xf32, #tpu.memory_space<vmem>>, vector<8x8xf32>,
    return
  }
  func.func @transform_0(%arg0: i32) -> (i32, i32) {
    %c0_i32 = arith.constant 0 : i32
    %c0_i32_0 = arith.constant 0 : i32
    return %arg0, %c0_i32 : i32, i32
  }
  func.func @transform_1(%arg0: i32) -> (i32, i32) {
    %c0_i32 = arith.constant 0 : i32
    %c0_i32_0 = arith.constant 0 : i32
    %c0_i32_1 = arith.constant 0 : i32
    return %c0_i32, %c0_i32_0 : i32, i32
  }
  func.func @transform_2(%arg0: i32) -> (i32, i32) {
    %c0_i32 = arith.constant 0 : i32
    %c0_i32_0 = arith.constant 0 : i32
    %c0_i32_1 = arith.constant 0 : i32
    return %c0_i32, %c0_i32_0 : i32, i32
  }
  func.func @transform_3(%arg0: i32) -> (i32, i32) {
    %c0_i32 = arith.constant 0 : i32
    %c0_i32_0 = arith.constant 0 : i32
    %c0_i32_1 = arith.constant 0 : i32
    return %c0_i32, %c0_i32_0 : i32, i32
  }
  func.func @transform_4(%arg0: i32) -> (i32, i32) {
    %c0_i32 = arith.constant 0 : i32
    %c0_i32_0 = arith.constant 0 : i32
    %c0_i32_1 = arith.constant 0 : i32
    return %c0_i32, %c0_i32_0 : i32, i32
  }
  func.func @transform_5(%arg0: i32) -> (i32, i32) {
    %c0_i32 = arith.constant 0 : i32
    %c0_i32_0 = arith.constant 0 : i32
    %c0_i32_1 = arith.constant 0 : i32
    return %c0_i32, %c0_i32_0 : i32, i32
  }
  func.func @transform_6(%arg0: i32) -> (i32, i32) {
    %c0_i32 = arith.constant 0 : i32
    %c0_i32_0 = arith.constant 0 : i32
    %c0_i32_1 = arith.constant 0 : i32
    return %c0_i32, %c0_i32_0 : i32, i32
  }
  func.func @transform_7(%arg0: i32) -> (i32, i32) {
    %c0_i32 = arith.constant 0 : i32
    %c0_i32_0 = arith.constant 0 : i32
    return %arg0, %c0_i32 : i32, i32
  }
}

</mosaic_0001>

<bundles_post_ra>
// kernel: tpu_custom_call.1
= control target key start
LH: loop header
LB: loop body
LE: loop exit
PB: predicated region body
PF: predicated region fallthrough
CT: control target
= control target key end

     0   :  { %v500_v3 = vmov 0.0|0.0   ;;  %vm501_vm0 = vmmov 0   ;;  %v502_v6 = vmov 0.0   ;;  %s678_s0 = inlined_call_operand.vmem [shape: f32[8,96], index: 0, kind: input, shape index: {}]   ;;  %s679_s1 = inlined_call_operand.vmem [shape: f32[96,96], index: 1, kind: input, shape index: {}]   ;;  %s680_s2 = inlined_call_operand.vmem [shape: f32[1,96], index: 2, kind: input, shape index: {}]   ;;  %s681_s3 = inlined_call_operand.vmem [shape: f32[96,48], index: 3, kind: input, shape index: {}]   ;;  %s682_s4 = inlined_call_operand.vmem [shape: f32[1,48], index: 4, kind: input, shape index: {}]   ;;  %s683_s5 = inlined_call_operand.vmem [shape: f32[48,8], index: 5, kind: input, shape index: {}]   ;;  %s684_s6 = inlined_call_operand.vmem [shape: f32[1,8], index: 6, kind: input, shape index: {}]   ;;  %s685_s7 = inlined_call_operand.hbm [shape: f32[8,8], index: 7, kind: output, shape index: {}]  }
   0x1   :  { %v28_v0 = vld [vmem:[%s679_s1] sm:$0xff]  ;;  %v29_v1 = vld [vmem:[%s679_s1 + $0x8] sm:$0xff]  ;;  %v30_v2 = vld [vmem:[%s679_s1 + $0x10] sm:$0xff]  ;;  %427 = vmatprep.subr.bf16.mxu0 %v500_v3  ;;  %382 = vmatprep.mubr.msk.f32.mxu0 %vm501_vm0, %v502_v6 }
   0x2   :  { %v428_v4 = vpack.c.bf16 %v29_v1, %v28_v0  ;;  %v31_v5 = vld [vmem:[%s679_s1 + $0x18] sm:$0xff]  ;;  %445 = vmatprep.subr.bf16.mxu1 %v500_v3  ;;  %409 = vmatprep.mubr.msk.f32.mxu1 %vm501_vm0, %v502_v6  ;;  %v32_v8 = vld [vmem:[%s679_s1 + $0x20] sm:$0xff]  ;;  %v33_v9 = vld [vmem:[%s679_s1 + $0x28] sm:$0xff] }
   0x3   :  { %v431_v7 = vpack.c.bf16 %v31_v5, %v30_v2  ;;  %v122_v10 = vld [vmem:[%s681_s3] sm:$0xff]  ;;  %v123_v11 = vld [vmem:[%s681_s3 + $0x8] sm:$0xff]  ;;  %v124_v13 = vld [vmem:[%s681_s3 + $0x10] sm:$0xff]  ;;  %v434_v15 = vpack.c.bf16 %v33_v9, %v32_v8 }
   0x4   :  { %429 = vmatpush3.bf16.msra.mxu0 %v428_v4  ;;  %v446_v12 = vpack.c.bf16 %v123_v11, %v122_v10  ;;  %v125_v14 = vld [vmem:[%s681_s3 + $0x18] sm:$0xff]  ;;  %v34_v16 = vld [vmem:[%s679_s1 + $0x30] sm:$0xff]  ;;  %v126_v19 = vld [vmem:[%s681_s3 + $0x20] sm:$0xff] }
   0x5   :  { %430 = vmatprep.subr.bf16.mxu0 %v500_v3  ;;  %v35_v17 = vld [vmem:[%s679_s1 + $0x38] sm:$0xff]  ;;  %v449_v18 = vpack.c.bf16 %v125_v14, %v124_v13  ;;  %v127_v20 = vld [vmem:[%s681_s3 + $0x28] sm:$0xff] }
   0x6   :  { %447 = vmatpush3.bf16.msra.mxu1 %v446_v12 }
   0x7   :  { %448 = vmatprep.subr.bf16.mxu1 %v500_v3 }
   0x8   :  { %432 = vmatpush3.bf16.msra.mxu0 %v431_v7 }
   0x9   :  { %433 = vmatprep.subr.bf16.mxu0 %v500_v3 }
   0xa   :  { %12 = vsyncpa [#allocation3], 0  ;;  %v437_v21 = vpack.c.bf16 %v35_v17, %v34_v16  ;;  %v36_v22 = vld [vmem:[%s679_s1 + $0x40] sm:$0xff]  ;;  %450 = vmatpush3.bf16.msra.mxu1 %v449_v18  ;;  %v452_v23 = vpack.c.bf16 %v127_v20, %v126_v19  ;;  %v37_v24 = vld [vmem:[%s679_s1 + $0x48] sm:$0xff]  ;;  %vm47_vm1 = vcmask 785408   ;;  %vm228_vm2 = vcmask 392192  }
   0xb   :  { %451 = vmatprep.subr.bf16.mxu1 %v500_v3  ;;  %v128_v25 = vld [vmem:[%s681_s3 + $0x30] sm:$0xff]  ;;  %v129_v26 = vld [vmem:[%s681_s3 + $0x38] sm:$0xff]  ;;  %v440_v27 = vpack.c.bf16 %v37_v24, %v36_v22  ;;  %v130_v31 = vld [vmem:[%s681_s3 + $0x40] sm:$0xff]  ;;  %s503_s19 = smov [#allocation2]   ;;  %vm303_vm3 = vcmask 64512  }
   0xc   :  { %435 = vmatpush3.bf16.msra.mxu0 %v434_v15  ;;  %v38_v28 = vld [vmem:[%s679_s1 + $0x50] sm:$0xff]  ;;  %v455_v29 = vpack.c.bf16 %v129_v26, %v128_v25  ;;  %v39_v30 = vld [vmem:[%s679_s1 + $0x58] sm:$0xff]  ;;  %v131_v32 = vld [vmem:[%s681_s3 + $0x48] sm:$0xff]  ;;  %s311_s20 = sshll.u32 %s503_s19, 4  ;;  %s312_s20 = int_to_ptr.vmem [resolvable:$true] %s311_s20 }
   0xd   :  { %436 = vmatprep.subr.bf16.mxu0 %v500_v3  ;;  %v443_v33 = vpack.c.bf16 %v39_v30, %v38_v28  ;;  %v458_v34 = vpack.c.bf16 %v131_v32, %v130_v31  ;;  %v27_v35 = vld [vmem:[%s678_s0] sm:$0xff]  ;;  %v132_v36 = vld [vmem:[%s681_s3 + $0x50] sm:$0xff]  ;;  %v133_v37 = vld [vmem:[%s681_s3 + $0x58] sm:$0xff]  ;;  %p481_p1 = scmp.lt.s32.totalorder %s312_s20, %s312_s20 }
   0xe   :  { %453 = vmatpush3.bf16.msra.mxu1 %v452_v23  ;;  %v461_v38 = vpack.c.bf16 %v133_v37, %v132_v36  ;;  %v215_v39 = vld [vmem:[%s683_s5] sm:$0xff]  ;;  %v216_v40 = vld [vmem:[%s683_s5 + $0x8] sm:$0xff]  ;;  %v217_v41 = vld [vmem:[%s683_s5 + $0x10] sm:$0xff] }
   0xf   :  { %454 = vmatprep.subr.bf16.mxu1 %v500_v3  ;;  %v464_v42 = vpack.c.bf16 %v216_v40, %v215_v39  ;;  %v218_v43 = vld [vmem:[%s683_s5 + $0x18] sm:$0xff]  ;;  %v319_v45 = vld [vmem:[%s680_s2] ss:$0 sm:$0xff]  ;;  %v220_v51 = vld [vmem:[%s683_s5 + $0x28] sm:$0xff] }
  0x10   :  { %438 = vmatpush3.bf16.msra.mxu0 %v437_v21  ;;  %v467_v44 = vpack.c.bf16 %v218_v43, %v217_v41  ;;  %v219_v50 = vld [vmem:[%s683_s5 + $0x20] sm:$0xff] }
  0x11   :  { %439 = vmatprep.subr.bf16.mxu0 %v500_v3  ;;  %v470_v52 = vpack.c.bf16 %v220_v51, %v219_v50  ;;  %v321_v53 = vld [vmem:[%s682_s4] ss:$0 sm:$0xff]  ;;  %s476_s4 = scalar_lea.vmem %s312_s20, 128 }
  0x12   :  { %456 = vmatpush3.bf16.msra.mxu1 %v455_v29  ;;  %v323_v58 = vld [vmem:[%s684_s6] ss:$0 sm:$0xff]  ;;  %p477_p0 = scmp.ne.s32.totalorder %s312_s20, %s476_s4  ;;  %p482_p2 = scmp.lt.s32.totalorder %s476_s4, %s476_s4 }
  0x13   :  { %457 = vmatprep.subr.bf16.mxu1 %v500_v3 }
  0x14   :  { %441 = vmatpush3.bf16.msra.mxu0 %v440_v27  ;;  %p483_p3 = por %p482_p2, %p481_p1 }
  0x15   :  { %442 = vmatprep.subr.bf16.mxu0 %v500_v3 }
  0x16   :  { %459 = vmatpush3.bf16.msra.mxu1 %v458_v34  ;;  %p484_p4 = pnand %p483_p3, %p477_p0 }
  0x17   :  { %460 = vmatprep.subr.bf16.mxu1 %v500_v3 }
  0x18   :  { %444 = vmatpush3.bf16.msra.mxu0 %v443_v33 }
  0x19   :  { %463 = vmatprep.subr.bf16.mxu0 %v500_v3 }
  0x1a   :  { %462 = vmatpush3.bf16.msra.mxu1 %v461_v38 }
  0x1b   :  { %383 = vmatmul.mubr.msk.f32.vlgmr.msra.gmra.mrb[0].mxu0 %vm47_vm1, %v27_v35 }
  0x1c   :  { %424 = vmatprep.mubr.msk.f32.mxu0 %vm501_vm0, %v502_v6  ;;  %465 = vmatpush3.bf16.msra.mxu0 %v464_v42 }
  0x1d   :  { %466 = vmatprep.subr.bf16.mxu0 %v500_v3 }
  0x20   :  { %468 = vmatpush3.bf16.msra.mxu0 %v467_v44 }
  0x21   :  { %469 = vmatprep.subr.bf16.mxu0 %v500_v3 }
  0x24   :  { %471 = vmatpush3.bf16.msra.mxu0 %v470_v52 }
  0xee   :  { %v117_v46 = vpop.f32.mrb[0].mxu0 }
  0xef   :  { %v118_v47 = vadd.f32 %v319_v45, %v117_v46  ;;  %v384_v48 = vpop.f32.mrb[1].mxu0 }
  0xf1   :  { %v121_v49 = vmax.f32 %v118_v47, 0.0 }
  0xf3   :  { %410 = vmatmul.mubr.msk.f32.vlgmr.msra.gmra.mrb[0].mxu1 %vm47_vm1, %v121_v49 }
 0x1c6   :  { %v210_v54 = vpop.f32.mrb[0].mxu1 }
 0x1c7   :  { %v211_v55 = vadd.f32 %v321_v53, %v210_v54  ;;  %v411_v56 = vpop.f32.mrb[1].mxu1 }
 0x1c9   :  { %v214_v57 = vmax.f32 %v211_v55, 0.0 }
 0x1cb   :  { %425 = vmatmul.mubr.msk.f32.vlgmr.msra.gmra.mrb[2].mxu0 %vm228_vm2, %v214_v57 }
 0x29e   :  { %v298_v59 = vpop.f32.mrb[2].mxu0 }
 0x29f   :  { %v299_v60 = vadd.f32 %v323_v58, %v298_v59  ;;  %v426_v61 = vpop.f32.mrb[3].mxu0 }
 0x2a1   :  { %v302_v62 = vmax.f32 %v299_v60, 0.0 }
 0x2a3   :  { %304 = vst.msk [vmem:[#allocation2] sm:$0xff] %vm303_vm3, %v302_v62 }
 0x2a4   :  { %487 = shalt.err (!%p484_p4)
}
 0x2a5   :  { %s488_s6 = scalar_lea.hbm %s685_s7, 128 }
 0x2a6   :  { %p489_p5 = scmp.ne.s32.totalorder %s685_s7, %s488_s6  ;;  %p492_p6 = scmp.lt.u32.totalorder %s488_s6, %s685_s7 }
 0x2a8   :  { %p494_p7 = pnand %p492_p6, %p489_p5 }
 0x2aa   :  { %497 = shalt.err (!%p494_p7)
}
 0x2ab   :  { %314 = dma.vmem_to_hbm [thread:$0]  %s312_s20, 128, %s685_s7, [#allocation3]  }
 0x2ac   :  { %498 = dma.done.wait [#allocation3], 128  }
 0x2ad   :  { %499 = vsyncadd [#allocation3], 4294967168 }
 0x2ae   :  { %318 = vsyncpa [#allocation3], 1 }

</bundles_post_ra>
